<compile_context>
chip_gen: v7x
topology: tpu7x:2x2x1
jax: 0.10.0
libtpu: 0.0.40
codegen_flags: <defaults>
</compile_context>

<pallas_src>
import functools

import jax
import jax.numpy as jnp
from jax import lax
from jax.experimental import pallas as pl
from jax.experimental.pallas import tpu as pltpu


EPS = 1e-5          # nn.InstanceNorm2d default eps
LANES = 128         # TPU vreg lane width


def _round_up(x, m):
    return (x + m - 1) // m * m


def cnn_block_kernel(z_ref, w_ref, b_ref, o_ref, y_ref, *, fuse_k):
    """Fused conv(4x4, s=2, p=1) + bias + ReLU + InstanceNorm for one (batch, C_out) tile.

    z_ref : (BT, P, Q, FC)   space-to-depth input, bf16 (P=OH+1, Q=OW+1, FC=4*C_in)
    w_ref : (4*FC, CT)       fused conv weight (K = 16*C_in), bf16
    b_ref : (1, CT)          conv bias (zero-padded), f32
    o_ref : (BT, S, CT)      output, bf16 (S = OH*OW)
    y_ref : (BT, S, CT)      f32 VMEM scratch for the bias+ReLU intermediate
    """
    bt, p, q, fc = z_ref.shape
    oh, ow = p - 1, q - 1
    s = oh * ow
    ct = o_ref.shape[-1]

    z = z_ref[...]                                           # (BT, P, Q, FC) bf16

    # 2x2 stride-1 conv over the space-to-depth input == original 4x4 stride-2 conv.
    windows = [z[:, di:di + oh, dj:dj + ow, :].reshape(bt * s, fc)
               for di in range(2) for dj in range(2)]
    if fuse_k:
        # Single MXU matmul with K = 16*C_in (4x higher K-utilization, one
        # vmatmul stream, no extra accumulator passes).
        zcat = jnp.concatenate(windows, axis=-1)             # (BT*S, 4*FC)
        acc = jnp.dot(zcat, w_ref[...], preferred_element_type=jnp.float32)
    else:
        # Fallback: four tap matmuls against slices of the same fused weight.
        acc = jnp.zeros((bt * s, ct), jnp.float32)
        for t, win in enumerate(windows):
            acc = acc + jnp.dot(win, w_ref[t * fc:(t + 1) * fc, :],
                                preferred_element_type=jnp.float32)

    # Bias + ReLU in f32; park the intermediate in an explicit VMEM scratch.
    y_ref[...] = jnp.maximum(acc + b_ref[...], 0.0).reshape(bt, s, ct)

    # InstanceNorm2d (affine=False): per-sample, per-channel spatial stats.
    # Two-pass variance for numerical safety.  Padded channels are all-zero ->
    # (0 - 0) * rsqrt(eps) == 0; they are sliced off by the consumer.
    y = y_ref[...]
    mean = jnp.mean(y, axis=1, keepdims=True)                # (BT, 1, CT)
    d = y - mean
    var = jnp.mean(d * d, axis=1, keepdims=True)
    o_ref[...] = (d * lax.rsqrt(var + EPS)).astype(o_ref.dtype)


def _space_to_depth_pad(x_nchw):
    """[N, C, H, W] -> z [N, (H+2)//2, (W+2)//2, 4*C] with feature order (a, b, c):
       z[n, p, q, (a, b, c)] = x_pad(pad=1)[n, c, 2p + a, 2q + b].
    Single ~1x-bytes XLA pass; for stacked blocks keep activations NHWC so this
    degenerates to a cheap reshape."""
    n, c, h, w = x_nchw.shape
    hp, wp = h + 2, w + 2
    x = jnp.pad(x_nchw, ((0, 0), (0, 0), (1, 1), (1, 1)))
    x = x.transpose(0, 2, 3, 1)                              # NHWC, padded
    x = x.reshape(n, hp // 2, 2, wp // 2, 2, c)              # [N, P, a, Q, b, C]
    x = x.transpose(0, 1, 3, 2, 4, 5)                        # [N, P, Q, a, b, C]
    return x.reshape(n, hp // 2, wp // 2, 4 * c)


def _weight_to_fused(weight, c_pad):
    """[C_out, C_in, 4, 4] -> [16*C_in, c_pad] with K index (di, dj, a, b, c):
       wf[((2di+dj)*4 + 2a + b)*C_in + c, co] = W[co, c, 2di + a, 2dj + b],
    matching the kernel's concat([window(di,dj) for di for dj], axis=-1) order."""
    c_out, c_in = weight.shape[:2]
    w = weight.reshape(c_out, c_in, 2, 2, 2, 2)              # [co, c, di, a, dj, b]
    w = w.transpose(2, 4, 3, 5, 1, 0)                        # [di, dj, a, b, c, co]
    w = w.reshape(16 * c_in, c_out)
    return jnp.pad(w, ((0, 0), (0, c_pad - c_out)))


def _vmem_budget_bytes():
    """~80% of this generation's VMEM (v7x: 64 MiB/TC, v5e/v6e: 128 MiB)."""
    cap = 64 << 20                                           # conservative default
    try:
        info = pltpu.get_tpu_info()
        cap = int(getattr(info, "vmem_capacity_bytes", cap) or cap)
    except Exception:
        pass
    return int(cap * 0.8)


def _vmem_per_step(bt, ct, p, q, fc, s):
    """Honest per-grid-step VMEM estimate: pipelined blocks + in-kernel temporaries."""
    bf16, f32 = 2, 4
    k = 4 * fc
    z_in = 2 * bt * p * q * fc * bf16        # input block, double-buffered
    o_out = 2 * bt * s * ct * bf16           # bf16 output block, double-buffered
    w_in = 2 * k * ct * bf16                 # weight block, double-buffered
    b_in = 2 * ct * f32
    y_scr = bt * s * ct * f32                # explicit f32 scratch
    win_t = bt * s * k * bf16                # 4 shifted-window copies
    cat_t = bt * s * k * bf16                # fused-K operand
    epi_t = 3 * bt * s * ct * f32            # f32 acc + (y - mean) + normalize temp
    return z_in + o_out + w_in + b_in + y_scr + win_t + cat_t + epi_t


def _pick_tiles(n, c_pad, p, q, fc, s, budget):
    def pick_bt(ct):
        divs = [d for d in range(1, n + 1) if n % d == 0]
        fits = [d for d in divs if _vmem_per_step(d, ct, p, q, fc, s) <= budget] or [1]
        pref = [d for d in fits if n // d >= 2] or fits      # keep >= 2 batch steps
        big = [d for d in pref if d * s >= 2048]             # matmul-M target
        return min(big) if big else max(pref)

    # C_out tile: lane-dense multiple of 128; split only wide layers (avoids
    # re-reading z per column block when C_out is narrow).
    c_tile = c_pad
    while c_tile > 512 and c_tile % 2 == 0 and (c_tile // 2) % 128 == 0:
        c_tile //= 2
    b_tile = pick_bt(c_tile)
    # v7x: guarantee >= 2 parallel grid steps; if batch alone can't, split C_out.
    if (n // b_tile) * (c_pad // c_tile) < 2 and c_tile % 256 == 0:
        c_tile //= 2
        b_tile = pick_bt(c_tile)
    return b_tile, c_tile


def cnn_block_forward(x, weight, bias, *, output_layout="NCHW"):
    """x: [N, C_in, H, W] (NCHW), weight: [C_out, C_in, 4, 4], bias: [C_out].

    output_layout="NHWC" returns [N, OH, OW, C_out] with no extra HBM passes
    (preferred for stacked blocks); "NCHW" matches the PyTorch module exactly.
    """
    n, c_in, h, w = x.shape
    c_out = weight.shape[0]
    assert h % 2 == 0 and w % 2 == 0, "space-to-depth path assumes even H, W"
    oh, ow = h // 2, w // 2
    s = oh * ow
    fc = 4 * c_in
    c_pad = _round_up(c_out, LANES)
    p, q = oh + 1, ow + 1

    # Dropout: identity (eval-mode).
    z = _space_to_depth_pad(x).astype(jnp.bfloat16)                   # [N, P, Q, FC]
    w_fused = _weight_to_fused(weight, c_pad).astype(jnp.bfloat16)    # [4*FC, CP]
    b_pad = jnp.pad(bias, (0, c_pad - c_out)).reshape(1, c_pad).astype(jnp.float32)

    budget = _vmem_budget_bytes()
    b_tile, c_tile = _pick_tiles(n, c_pad, p, q, fc, s, budget - (4 << 20))
    grid = (n // b_tile, c_pad // c_tile)

    def build(fuse_k):
        return pl.pallas_call(
            functools.partial(cnn_block_kernel, fuse_k=fuse_k),
            out_shape=jax.ShapeDtypeStruct((n, s, c_pad), jnp.bfloat16),
            grid_spec=pltpu.PrefetchScalarGridSpec(
                num_scalar_prefetch=0,
                grid=grid,
                in_specs=[
                    pl.BlockSpec((b_tile, p, q, fc), lambda i, j: (i, 0, 0, 0)),
                    pl.BlockSpec((4 * fc, c_tile), lambda i, j: (0, j)),
                    pl.BlockSpec((1, c_tile), lambda i, j: (0, j)),
                ],
                out_specs=pl.BlockSpec((b_tile, s, c_tile), lambda i, j: (i, 0, j)),
                scratch_shapes=[pltpu.VMEM((b_tile, s, c_tile), jnp.float32)],
            ),
            compiler_params=pltpu.CompilerParams(
                dimension_semantics=("parallel", "parallel"),
                vmem_limit_bytes=int(budget),
            ),
        )

    try:
        out = build(fuse_k=True)(z, w_fused, b_pad)
    except Exception:
        # Fallback for Mosaic builds without unaligned lane-dim concatenate.
        out = build(fuse_k=False)(z, w_fused, b_pad)

    out = out.reshape(n, oh, ow, c_pad)          # metadata-only reshape (free)
    if output_layout == "NHWC":
        return out[..., :c_out]
    # Module-parity NCHW output (costs a slice + transpose HBM pass; stacked
    # blocks should use NHWC instead).
    return out[..., :c_out].transpose(0, 3, 1, 2).astype(jnp.float32)


def reference_forward(x, weight, bias, matmul_dtype=jnp.float32):
    """Plain-JAX reference.  matmul_dtype=bfloat16 mirrors the kernel's MXU precision."""
    y = lax.conv_general_dilated(
        x.astype(matmul_dtype), weight.astype(matmul_dtype),
        window_strides=(2, 2), padding=((1, 1), (1, 1)),
        dimension_numbers=("NCHW", "OIHW", "NCHW"),
        preferred_element_type=jnp.float32)
    y = y + bias.reshape(1, -1, 1, 1)
    y = jnp.maximum(y, 0.0)
    mean = jnp.mean(y, axis=(2, 3), keepdims=True)
    var = jnp.mean((y - mean) ** 2, axis=(2, 3), keepdims=True)
    return (y - mean) * lax.rsqrt(var + EPS)


if __name__ == "__main__":
    key = jax.random.PRNGKey(0)
    k_x, k_w, k_b = jax.random.split(key, 3)

    N, C_IN, C_OUT, H, W = 2, 4, 8, 16, 16
    x = jax.random.normal(k_x, (N, C_IN, H, W), dtype=jnp.float32)
    # Deterministic parameter init (shapes from nn.Conv2d(C_IN, C_OUT, 4, 2, 1))
    fan_in = C_IN * 4 * 4
    bound = 1.0 / (fan_in ** 0.5)
    weight = jax.random.uniform(k_w, (C_OUT, C_IN, 4, 4), jnp.float32, -bound, bound)
    bias = jax.random.uniform(k_b, (C_OUT,), jnp.float32, -bound, bound)

    out = jax.block_until_ready(cnn_block_forward(x, weight, bias))
    assert out.shape == (N, C_OUT, H // 2, W // 2)

    # Check against a reference using the same bf16 matmul precision (the kernel
    # additionally stores its output in bf16).
    ref_bf16 = jax.block_until_ready(reference_forward(x, weight, bias, jnp.bfloat16))
    assert jnp.allclose(out, ref_bf16, atol=3e-2, rtol=3e-2), \
        float(jnp.max(jnp.abs(out - ref_bf16)))

    # Looser sanity check against full-f32 module semantics (bf16 MXU inputs and
    # bf16 output storage are the only deliberate precision differences).
    ref_f32 = jax.block_until_ready(reference_forward(x, weight, bias, jnp.float32))
    assert jnp.allclose(out, ref_f32, atol=1e-1, rtol=1e-1), \
        float(jnp.max(jnp.abs(out - ref_f32)))

    # Also exercise the zero-extra-HBM-pass NHWC path used for stacked blocks.
    out_nhwc = jax.block_until_ready(
        cnn_block_forward(x, weight, bias, output_layout="NHWC"))
    assert out_nhwc.shape == (N, H // 2, W // 2, C_OUT)
    assert jnp.allclose(out_nhwc.transpose(0, 3, 1, 2).astype(jnp.float32), out)

    print("KERNEL_OK")
</pallas_src>

<mosaic_0001>
module attributes {stable_mosaic.version = 11 : i64} {
  func.func @cnn_block_kernel(%arg0: i32, %arg1: i32, %arg2: memref<1x9x9x16xbf16, #tpu.memory_space<vmem>>, %arg3: memref<64x128xbf16, #tpu.memory_space<vmem>>, %arg4: memref<1x128xf32, #tpu.memory_space<vmem>>, %arg5: memref<1x64x128xbf16, #tpu.memory_space<vmem>>, %arg6: memref<1x64x128xf32, #tpu.memory_space<vmem>>) attributes {dimension_semantics = [#tpu.dimension_semantics<parallel>, #tpu.dimension_semantics<parallel>], iteration_bounds = array<i64: 2, 1>, scalar_prefetch = 0 : i64, scratch_operands = 1 : i64, tpu.core_type = #tpu.core_type<tc>, window_params = [{transform_indices = @transform_0, window_bounds = array<i64: 1, 9, 9, 16>}, {transform_indices = @transform_1, window_bounds = array<i64: 64, 128>}, {transform_indices = @transform_2, window_bounds = array<i64: 1, 128>}, {transform_indices = @transform_3, window_bounds = array<i64: 1, 64, 128>}]} {
    %c0 = arith.constant 0 : index
    %c0_0 = arith.constant 0 : index
    %c0_1 = arith.constant 0 : index
    %c0_2 = arith.constant 0 : index
    %0 = vector.load %arg2[%c0, %c0_0, %c0_1, %c0_2] : memref<1x9x9x16xbf16, #tpu.memory_space<vmem>>, vector<1x9x9x16xbf16>
    %1 = vector.extract_strided_slice %0 {offsets = [0, 0, 0, 0], sizes = [1, 8, 8, 16], strides = [1, 1, 1, 1]} : vector<1x9x9x16xbf16> to vector<1x8x8x16xbf16>
    %2 = vector.shape_cast %1 : vector<1x8x8x16xbf16> to vector<64x16xbf16>
    %3 = vector.extract_strided_slice %0 {offsets = [0, 0, 1, 0], sizes = [1, 8, 8, 16], strides = [1, 1, 1, 1]} : vector<1x9x9x16xbf16> to vector<1x8x8x16xbf16>
    %4 = vector.shape_cast %3 : vector<1x8x8x16xbf16> to vector<64x16xbf16>
    %5 = vector.extract_strided_slice %0 {offsets = [0, 1, 0, 0], sizes = [1, 8, 8, 16], strides = [1, 1, 1, 1]} : vector<1x9x9x16xbf16> to vector<1x8x8x16xbf16>
    %6 = vector.shape_cast %5 : vector<1x8x8x16xbf16> to vector<64x16xbf16>
    %7 = vector.extract_strided_slice %0 {offsets = [0, 1, 1, 0], sizes = [1, 8, 8, 16], strides = [1, 1, 1, 1]} : vector<1x9x9x16xbf16> to vector<1x8x8x16xbf16>
    %8 = vector.shape_cast %7 : vector<1x8x8x16xbf16> to vector<64x16xbf16>
    %9 = tpu.concatenate %2, %4, %6, %8 in 1 : vector<64x16xbf16>, vector<64x16xbf16>, vector<64x16xbf16>, vector<64x16xbf16> -> vector<64x64xbf16>
    %c0_3 = arith.constant 0 : index
    %c0_4 = arith.constant 0 : index
    %10 = vector.load %arg3[%c0_3, %c0_4] : memref<64x128xbf16, #tpu.memory_space<vmem>>, vector<64x128xbf16>
    %cst = arith.constant dense<0.000000e+00> : vector<64x128xf32>
    %11 = tpu.matmul %9, %10, %cst {dimension_numbers = #tpu.dot_dimension_numbers<[1], [0], [0], [1], [0, 0, 1, 1], [], []>} : vector<64x64xbf16>, vector<64x128xbf16>, vector<64x128xf32> -> vector<64x128xf32>
    %c0_5 = arith.constant 0 : index
    %c0_6 = arith.constant 0 : index
    %12 = vector.load %arg4[%c0_5, %c0_6] : memref<1x128xf32, #tpu.memory_space<vmem>>, vector<1x128xf32>
    %13 = vector.broadcast %12 : vector<1x128xf32> to vector<64x128xf32>
    %14 = arith.addf %11, %13 : vector<64x128xf32>
    %cst_7 = arith.constant 0.000000e+00 : f32
    %15 = vector.broadcast %cst_7 : f32 to vector<64x128xf32>
    %16 = arith.maximumf %14, %15 : vector<64x128xf32>
    %17 = vector.shape_cast %16 : vector<64x128xf32> to vector<1x64x128xf32>
    %c0_8 = arith.constant 0 : index
    %c0_9 = arith.constant 0 : index
    %c0_10 = arith.constant 0 : index
    %18 = vector.load %arg6[%c0_8, %c0_9, %c0_10] : memref<1x64x128xf32, #tpu.memory_space<vmem>>, vector<1x64x128xf32>
    tpu.vector_store %arg6[%c0_8, %c0_9, %c0_10], %17 {strides = array<i32>} : memref<1x64x128xf32, #tpu.memory_space<vmem>>, vector<1x64x128xf32>,
    %c0_11 = arith.constant 0 : index
    %c0_12 = arith.constant 0 : index
    %c0_13 = arith.constant 0 : index
    %19 = vector.load %arg6[%c0_11, %c0_12, %c0_13] : memref<1x64x128xf32, #tpu.memory_space<vmem>>, vector<1x64x128xf32>
    %cst_14 = arith.constant dense<0.000000e+00> : vector<1x128xf32>
    %20 = vector.multi_reduction <add>, %19, %cst_14 [1] : vector<1x64x128xf32> to vector<1x128xf32>
    %21 = vector.shape_cast %20 : vector<1x128xf32> to vector<1x1x128xf32>
    %cst_15 = arith.constant 6.400000e+01 : f32
    %22 = vector.broadcast %cst_15 : f32 to vector<1x1x128xf32>
    %23 = arith.divf %21, %22 : vector<1x1x128xf32>
    %24 = vector.broadcast %23 : vector<1x1x128xf32> to vector<1x64x128xf32>
    %25 = arith.subf %19, %24 : vector<1x64x128xf32>
    %26 = arith.mulf %25, %25 : vector<1x64x128xf32>
    %cst_16 = arith.constant dense<0.000000e+00> : vector<1x128xf32>
    %27 = vector.multi_reduction <add>, %26, %cst_16 [1] : vector<1x64x128xf32> to vector<1x128xf32>
    %28 = vector.shape_cast %27 : vector<1x128xf32> to vector<1x1x128xf32>
    %cst_17 = arith.constant 6.400000e+01 : f32
    %29 = vector.broadcast %cst_17 : f32 to vector<1x1x128xf32>
    %30 = arith.divf %28, %29 : vector<1x1x128xf32>
    %cst_18 = arith.constant 9.99999974E-6 : f32
    %31 = vector.broadcast %cst_18 : f32 to vector<1x1x128xf32>
    %32 = arith.addf %30, %31 : vector<1x1x128xf32>
    %33 = math.rsqrt %32 : vector<1x1x128xf32>
    %34 = vector.broadcast %33 : vector<1x1x128xf32> to vector<1x64x128xf32>
    %35 = arith.mulf %25, %34 : vector<1x64x128xf32>
    %36 = arith.truncf %35 : vector<1x64x128xf32> to vector<1x64x128xbf16>
    %c0_19 = arith.constant 0 : index
    %c0_20 = arith.constant 0 : index
    %c0_21 = arith.constant 0 : index
    %37 = vector.load %arg5[%c0_19, %c0_20, %c0_21] : memref<1x64x128xbf16, #tpu.memory_space<vmem>>, vector<1x64x128xbf16>
    tpu.vector_store %arg5[%c0_19, %c0_20, %c0_21], %36 {strides = array<i32>} : memref<1x64x128xbf16, #tpu.memory_space<vmem>>, vector<1x64x128xbf16>,
    return
  }
  func.func @transform_0(%arg0: i32, %arg1: i32) -> (i32, i32, i32, i32) {
    %c0_i32 = arith.constant 0 : i32
    %c0_i32_0 = arith.constant 0 : i32
    %c0_i32_1 = arith.constant 0 : i32
    %c0_i32_2 = arith.constant 0 : i32
    return %arg0, %c0_i32, %c0_i32_0, %c0_i32_1 : i32, i32, i32, i32
  }
  func.func @transform_1(%arg0: i32, %arg1: i32) -> (i32, i32) {
    %c0_i32 = arith.constant 0 : i32
    %c0_i32_0 = arith.constant 0 : i32
    return %c0_i32, %arg1 : i32, i32
  }
  func.func @transform_2(%arg0: i32, %arg1: i32) -> (i32, i32) {
    %c0_i32 = arith.constant 0 : i32
    %c0_i32_0 = arith.constant 0 : i32
    return %c0_i32, %arg1 : i32, i32
  }
  func.func @transform_3(%arg0: i32, %arg1: i32) -> (i32, i32, i32) {
    %c0_i32 = arith.constant 0 : i32
    %c0_i32_0 = arith.constant 0 : i32
    return %arg0, %c0_i32, %arg1 : i32, i32, i32
  }
}

module attributes {stable_mosaic.version = 11 : i64} {
  func.func @cnn_block_kernel(%arg0: i32, %arg1: i32, %arg2: memref<1x9x9x16xbf16, #tpu.memory_space<vmem>>, %arg3: memref<64x128xbf16, #tpu.memory_space<vmem>>, %arg4: memref<1x128xf32, #tpu.memory_space<vmem>>, %arg5: memref<1x64x128xbf16, #tpu.memory_space<vmem>>, %arg6: memref<1x64x128xf32, #tpu.memory_space<vmem>>) attributes {dimension_semantics = [#tpu.dimension_semantics<parallel>, #tpu.dimension_semantics<parallel>], iteration_bounds = array<i64: 2, 1>, scalar_prefetch = 0 : i64, scratch_operands = 1 : i64, tpu.core_type = #tpu.core_type<tc>, window_params = [{transform_indices = @transform_0, window_bounds = array<i64: 1, 9, 9, 16>}, {transform_indices = @transform_1, window_bounds = array<i64: 64, 128>}, {transform_indices = @transform_2, window_bounds = array<i64: 1, 128>}, {transform_indices = @transform_3, window_bounds = array<i64: 1, 64, 128>}]} {
    %c0 = arith.constant 0 : index
    %c0_0 = arith.constant 0 : index
    %c0_1 = arith.constant 0 : index
    %c0_2 = arith.constant 0 : index
    %0 = vector.load %arg2[%c0, %c0_0, %c0_1, %c0_2] : memref<1x9x9x16xbf16, #tpu.memory_space<vmem>>, vector<1x9x9x16xbf16>
    %1 = vector.extract_strided_slice %0 {offsets = [0, 0, 0, 0], sizes = [1, 8, 8, 16], strides = [1, 1, 1, 1]} : vector<1x9x9x16xbf16> to vector<1x8x8x16xbf16>
    %2 = vector.shape_cast %1 : vector<1x8x8x16xbf16> to vector<64x16xbf16>
    %3 = vector.extract_strided_slice %0 {offsets = [0, 0, 1, 0], sizes = [1, 8, 8, 16], strides = [1, 1, 1, 1]} : vector<1x9x9x16xbf16> to vector<1x8x8x16xbf16>
    %4 = vector.shape_cast %3 : vector<1x8x8x16xbf16> to vector<64x16xbf16>
    %5 = vector.extract_strided_slice %0 {offsets = [0, 1, 0, 0], sizes = [1, 8, 8, 16], strides = [1, 1, 1, 1]} : vector<1x9x9x16xbf16> to vector<1x8x8x16xbf16>
    %6 = vector.shape_cast %5 : vector<1x8x8x16xbf16> to vector<64x16xbf16>
    %7 = vector.extract_strided_slice %0 {offsets = [0, 1, 1, 0], sizes = [1, 8, 8, 16], strides = [1, 1, 1, 1]} : vector<1x9x9x16xbf16> to vector<1x8x8x16xbf16>
    %8 = vector.shape_cast %7 : vector<1x8x8x16xbf16> to vector<64x16xbf16>
    %cst = arith.constant 0.000000e+00 : f32
    %9 = vector.broadcast %cst : f32 to vector<64x128xf32>
    %c0_3 = arith.constant 0 : index
    %c0_4 = arith.constant 0 : index
    %10 = vector.load %arg3[%c0_3, %c0_4] : memref<64x128xbf16, #tpu.memory_space<vmem>>, vector<16x128xbf16>
    %cst_5 = arith.constant dense<0.000000e+00> : vector<64x128xf32>
    %11 = tpu.matmul %2, %10, %cst_5 {dimension_numbers = #tpu.dot_dimension_numbers<[1], [0], [0], [1], [0, 0, 1, 1], [], []>} : vector<64x16xbf16>, vector<16x128xbf16>, vector<64x128xf32> -> vector<64x128xf32>
    %12 = arith.addf %9, %11 : vector<64x128xf32>
    %c16 = arith.constant 16 : index
    %c0_6 = arith.constant 0 : index
    %13 = vector.load %arg3[%c16, %c0_6] : memref<64x128xbf16, #tpu.memory_space<vmem>>, vector<16x128xbf16>
    %cst_7 = arith.constant dense<0.000000e+00> : vector<64x128xf32>
    %14 = tpu.matmul %4, %13, %cst_7 {dimension_numbers = #tpu.dot_dimension_numbers<[1], [0], [0], [1], [0, 0, 1, 1], [], []>} : vector<64x16xbf16>, vector<16x128xbf16>, vector<64x128xf32> -> vector<64x128xf32>
    %15 = arith.addf %12, %14 : vector<64x128xf32>
    %c32 = arith.constant 32 : index
    %c0_8 = arith.constant 0 : index
    %16 = vector.load %arg3[%c32, %c0_8] : memref<64x128xbf16, #tpu.memory_space<vmem>>, vector<16x128xbf16>
    %cst_9 = arith.constant dense<0.000000e+00> : vector<64x128xf32>
    %17 = tpu.matmul %6, %16, %cst_9 {dimension_numbers = #tpu.dot_dimension_numbers<[1], [0], [0], [1], [0, 0, 1, 1], [], []>} : vector<64x16xbf16>, vector<16x128xbf16>, vector<64x128xf32> -> vector<64x128xf32>
    %18 = arith.addf %15, %17 : vector<64x128xf32>
    %c48 = arith.constant 48 : index
    %c0_10 = arith.constant 0 : index
    %19 = vector.load %arg3[%c48, %c0_10] : memref<64x128xbf16, #tpu.memory_space<vmem>>, vector<16x128xbf16>
    %cst_11 = arith.constant dense<0.000000e+00> : vector<64x128xf32>
    %20 = tpu.matmul %8, %19, %cst_11 {dimension_numbers = #tpu.dot_dimension_numbers<[1], [0], [0], [1], [0, 0, 1, 1], [], []>} : vector<64x16xbf16>, vector<16x128xbf16>, vector<64x128xf32> -> vector<64x128xf32>
    %21 = arith.addf %18, %20 : vector<64x128xf32>
    %c0_12 = arith.constant 0 : index
    %c0_13 = arith.constant 0 : index
    %22 = vector.load %arg4[%c0_12, %c0_13] : memref<1x128xf32, #tpu.memory_space<vmem>>, vector<1x128xf32>
    %23 = vector.broadcast %22 : vector<1x128xf32> to vector<64x128xf32>
    %24 = arith.addf %21, %23 : vector<64x128xf32>
    %cst_14 = arith.constant 0.000000e+00 : f32
    %25 = vector.broadcast %cst_14 : f32 to vector<64x128xf32>
    %26 = arith.maximumf %24, %25 : vector<64x128xf32>
    %27 = vector.shape_cast %26 : vector<64x128xf32> to vector<1x64x128xf32>
    %c0_15 = arith.constant 0 : index
    %c0_16 = arith.constant 0 : index
    %c0_17 = arith.constant 0 : index
    %28 = vector.load %arg6[%c0_15, %c0_16, %c0_17] : memref<1x64x128xf32, #tpu.memory_space<vmem>>, vector<1x64x128xf32>
    tpu.vector_store %arg6[%c0_15, %c0_16, %c0_17], %27 {strides = array<i32>} : memref<1x64x128xf32, #tpu.memory_space<vmem>>, vector<1x64x128xf32>,
    %c0_18 = arith.constant 0 : index
    %c0_19 = arith.constant 0 : index
    %c0_20 = arith.constant 0 : index
    %29 = vector.load %arg6[%c0_18, %c0_19, %c0_20] : memref<1x64x128xf32, #tpu.memory_space<vmem>>, vector<1x64x128xf32>
    %cst_21 = arith.constant dense<0.000000e+00> : vector<1x128xf32>
    %30 = vector.multi_reduction <add>, %29, %cst_21 [1] : vector<1x64x128xf32> to vector<1x128xf32>
    %31 = vector.shape_cast %30 : vector<1x128xf32> to vector<1x1x128xf32>
    %cst_22 = arith.constant 6.400000e+01 : f32
    %32 = vector.broadcast %cst_22 : f32 to vector<1x1x128xf32>
    %33 = arith.divf %31, %32 : vector<1x1x128xf32>
    %34 = vector.broadcast %33 : vector<1x1x128xf32> to vector<1x64x128xf32>
    %35 = arith.subf %29, %34 : vector<1x64x128xf32>
    %36 = arith.mulf %35, %35 : vector<1x64x128xf32>
    %cst_23 = arith.constant dense<0.000000e+00> : vector<1x128xf32>
    %37 = vector.multi_reduction <add>, %36, %cst_23 [1] : vector<1x64x128xf32> to vector<1x128xf32>
    %38 = vector.shape_cast %37 : vector<1x128xf32> to vector<1x1x128xf32>
    %cst_24 = arith.constant 6.400000e+01 : f32
    %39 = vector.broadcast %cst_24 : f32 to vector<1x1x128xf32>
    %40 = arith.divf %38, %39 : vector<1x1x128xf32>
    %cst_25 = arith.constant 9.99999974E-6 : f32
    %41 = vector.broadcast %cst_25 : f32 to vector<1x1x128xf32>
    %42 = arith.addf %40, %41 : vector<1x1x128xf32>
    %43 = math.rsqrt %42 : vector<1x1x128xf32>
    %44 = vector.broadcast %43 : vector<1x1x128xf32> to vector<1x64x128xf32>
    %45 = arith.mulf %35, %44 : vector<1x64x128xf32>
    %46 = arith.truncf %45 : vector<1x64x128xf32> to vector<1x64x128xbf16>
    %c0_26 = arith.constant 0 : index
    %c0_27 = arith.constant 0 : index
    %c0_28 = arith.constant 0 : index
    %47 = vector.load %arg5[%c0_26, %c0_27, %c0_28] : memref<1x64x128xbf16, #tpu.memory_space<vmem>>, vector<1x64x128xbf16>
    tpu.vector_store %arg5[%c0_26, %c0_27, %c0_28], %46 {strides = array<i32>} : memref<1x64x128xbf16, #tpu.memory_space<vmem>>, vector<1x64x128xbf16>,
    return
  }
  func.func @transform_0(%arg0: i32, %arg1: i32) -> (i32, i32, i32, i32) {
    %c0_i32 = arith.constant 0 : i32
    %c0_i32_0 = arith.constant 0 : i32
    %c0_i32_1 = arith.constant 0 : i32
    %c0_i32_2 = arith.constant 0 : i32
    return %arg0, %c0_i32, %c0_i32_0, %c0_i32_1 : i32, i32, i32, i32
  }
  func.func @transform_1(%arg0: i32, %arg1: i32) -> (i32, i32) {
    %c0_i32 = arith.constant 0 : i32
    %c0_i32_0 = arith.constant 0 : i32
    return %c0_i32, %arg1 : i32, i32
  }
  func.func @transform_2(%arg0: i32, %arg1: i32) -> (i32, i32) {
    %c0_i32 = arith.constant 0 : i32
    %c0_i32_0 = arith.constant 0 : i32
    return %c0_i32, %arg1 : i32, i32
  }
  func.func @transform_3(%arg0: i32, %arg1: i32) -> (i32, i32, i32) {
    %c0_i32 = arith.constant 0 : i32
    %c0_i32_0 = arith.constant 0 : i32
    return %arg0, %c0_i32, %arg1 : i32, i32, i32
  }
}

</mosaic_0001>

<bundles_post_ra>
// kernel: tpu_custom_call.1
= control target key start
LH: loop header
LB: loop body
LE: loop exit
PB: predicated region body
PF: predicated region fallthrough
CT: control target
= control target key end

     0   :  { %8 = vsyncpa [#allocation4], 0  ;;  %s1367_s0 = inlined_call_operand.vmem [shape: bf16[2,9,9,16], index: 0, kind: input, shape index: {}]   ;;  %s1368_s1 = inlined_call_operand.vmem [shape: bf16[64,128], index: 1, kind: input, shape index: {}]   ;;  %s1369_s2 = inlined_call_operand.vmem [shape: f32[1,128], index: 2, kind: input, shape index: {}]   ;;  %s1370_s3 = inlined_call_operand.hbm [shape: bf16[2,64,128], index: 3, kind: output, shape index: {}]  }
   0x1   :  { %10 = vsyncpa [#allocation4 + $0x1], 0  ;;  %s1098_s12 = smov 0   ;;  %s1100_s13 = smov 0  }
   0x2   :  { %s1102_s14 = smov 0   ;;  %s1104_s15 = smov 0  }
   0x3   :  { %s1106_s16 = smov 0   ;;  %s1108_s17 = smov 0  }
   0x4 LB: > { %s806_s18 = sadd.s32 4294967295, %s1070_s17   ;;  %s807_s19 = sadd.s32 4294967294, %s1070_s17   ;;  %s1070_s17 = sphi %s1108_s17, %s16_s17   ;;  %s1066_s16 = sphi %s1106_s16, %s1379_s16   ;;  %s1062_s15 = sphi %s1104_s15, %s1378_s15   ;;  %s1058_s14 = sphi %s1102_s14, %s1377_s14   ;;  %s1054_s13 = sphi %s1100_s13, %s1376_s13   ;;  %s1050_s12 = sphi %s1098_s12, %s1375_s12  }
   0x5   : > { %s28_s20 = sadd.s32 1, %s1066_s16  ;;  %s115_s21 = sadd.s32 1, %s1058_s14 }
   0x6   : > { %p30_p0 = scmp.ge.s32.totalorder %s28_s20, 2  ;;  %p125_p1 = scmp.ne.s32.totalorder %s1058_s14, %s1054_s13 }
   0x7   : > { %p126_p2 = scmp.eq.s32.totalorder %s806_s18, 1  ;;  %p131_p3 = scmp.ne.s32.totalorder %s1054_s13, %s1050_s12 }
   0x8   : > { %s1381_s20 = smov (%p30_p0, %s28_s20), 0  ;;  %p132_p5 = scmp.eq.s32.totalorder %s807_s19, 1 }
   0x9   : > { %p1138_p4 = por %p126_p2, %p125_p1  ;;  %s110_s23 = ssub.s32 %s1066_s16, %s1381_s20 }
   0xa   : > { %p812_p6 = scmp.ge.s32.totalorder %s1070_s17, 1  ;;  %p113_p7 = scmp.eq.s32.totalorder %s110_s23, 0 }
   0xb   : > { %p1145_p8 = por %p132_p5, %p131_p3  ;;  %p171_p9 = scmp.lt.s32.totalorder %s1070_s17, 3 }
   0xc   : > { %s1151_s25 = scalar_select %p113_p7, %s1058_s14, %s115_s21  }
   0xd   : > { %p172_p10 = pnand %p812_p6, %p171_p9 }
   0xe   : > { %p202_p11 = scmp.lt.s32.totalorder (!%p172_p10), %s1062_s15, 1  ;;  %v982_v0 = vld [vmem:[%s1368_s1] sm:$0xff] (!%p172_p10)   ;;  %v983_v1 = vld [vmem:[%s1368_s1 + $0x8] sm:$0xff] (!%p172_p10)   ;;  %vm233_vm0 = vsmask.f32 (!%p172_p10), 3328  ;;  %s1072_s8 = smov (!%p172_p10), 32  }
   0xf   : > { %175 = sbr.rel (%p172_p10) target bundleno = 483 (0x1e3), region = 32  ;;  %893 = vmatprep.subr.bf16.mxu0 (!%p172_p10), %v982_v0  ;;  %909 = vmatprep.subr.bf16.mxu1 (!%p172_p10), %v982_v0  ;;  %vm234_vm1 = vsmask.f32 (!%p172_p10), 7440  ;;  %v985_v40 = vld [vmem:[%s1368_s1 + $0x10] sm:$0xff] (!%p172_p10)   ;;  %s1073_s19 = smov (!%p172_p10), 16   ;;  %vm429_vm3 = vcmask (!%p172_p10), 130048  }
  0x10   : > { %894 = vmatpush3.bf16.msra.mxu0 (!%p172_p10), %v982_v0  ;;  %913 = vmatpush3.bf16.msra.mxu1 (!%p172_p10), %v982_v0  ;;  %vm1244_vm2 = vmor (!%p172_p10), %vm233_vm0, %vm234_vm1  ;;  %s1074_s21 = smov (!%p172_p10), 48   ;;  %vm442_vm4 = vcmask (!%p172_p10), 261120   ;;  %vm451_vm5 = vcmask (!%p172_p10), 392192   ;;  %vm499_vm6 = vcmask (!%p172_p10), 523264   ;;  %s199_s27 = sand.u32 (!%p172_p10), 1, %s1054_s13  }
  0x11   : > { %895 = vmatprep.subr.bf16.mxu0 (!%p172_p10), %v983_v1  ;;  %910 = vmatprep.subr.bf16.mxu1 (!%p172_p10), %v983_v1  ;;  %s813_s28 = sshll.u32 (!%p172_p10), %s199_s27, 5  ;;  %s861_s29 = sshll.u32 (!%p172_p10), %s1062_s15, 9 }
  0x12   : > { %s201_s30 = scalar_lea.vmem (!%p172_p10), [#allocation3], %s813_s28  ;;  %s1075_s9 = smov (!%p172_p10), [#allocation3]  }
  0x13   : > { %s996_s10 = sshll.u32 (!%p172_p10), %s1075_s9, 4  ;;  %s997_s10 = int_to_ptr.vmem [resolvable:$false] %s996_s10 }
  0x14   : > { %896 = vmatpush3.bf16.msra.mxu0 (!%p172_p10), %v983_v1  ;;  %914 = vmatpush3.bf16.msra.mxu1 (!%p172_p10), %v983_v1  ;;  %s998_s11 = scalar_lea.vmem (!%p172_p10), %s997_s10, 1024 }
  0x15   : > { %897 = vmatprep.subr.bf16.mxu0 (!%p172_p10), %v985_v40  ;;  %911 = vmatprep.subr.bf16.mxu1 (!%p172_p10), %v985_v40 }
  0x16   : > { %s203_s26 = scalar_select %p202_p11, %s1062_s15, 1 }
  0x17   : > { %s1321_s15 = scalar_lea.sflag [#allocation4], %s199_s27 }
  0x18   : > { %s917_s4 = smul.u32 72, %s203_s26  ;;  %898 = vmatpush3.bf16.msra.mxu0 %v985_v40  ;;  %915 = vmatpush3.bf16.msra.mxu1 %v985_v40 }
  0x1a   : > { %s1164_s7 = scalar_lea.vmem %s1367_s0, %s917_s4  ;;  %s707_s4 = sshll.u32 %s201_s30, 4  ;;  %s1319_s4 = int_to_ptr.vmem [resolvable:$true] %s707_s4 }
  0x1b   : > { %v1167_v2 = vld [vmem:[%s1164_s7 + $0x8] sm:$0xf]  ;;  %v1170_v3 = vld [vmem:[%s1164_s7 + $0x10] sm:$0xf]  ;;  %v1173_v4 = vld [vmem:[%s1164_s7 + $0x18] sm:$0xf]  ;;  %p999_p1 = scmp.lt.s32.totalorder %s1319_s4, %s997_s10 }
  0x1c   : > { %v265_v5 = vshrl.u32 %v1170_v3, 16  ;;  %v268_v6 = vshll.u32 %v1170_v3, 16  ;;  %v823_v7 = vcombine.low %v1167_v2, %v1170_v3  ;;  %v251_v8 = vshrl.u32 %v1167_v2, 16  ;;  %v1181_v9 = vld [vmem:[%s1164_s7 + $0x20] sm:$0xf] }
  0x1d   : > { %v254_v10 = vshll.u32 %v1167_v2, 16  ;;  %v279_v11 = vshrl.u32 %v1173_v4, 16  ;;  %v282_v12 = vshll.u32 %v1173_v4, 16  ;;  %v293_v13 = vshrl.u32 %v1181_v9, 16  ;;  %v1188_v14 = vld [vmem:[%s1164_s7 + $0x28] sm:$0xf] }
  0x1e   : > { %v1190_v15 = vrot.slane %v265_v5, 4  ;;  %v1192_v16 = vrot.slane %v268_v6, 5  ;;  %408 = vrot.lane.b32.xlu1 %v823_v7, %s1072_s8  ;;  %v253_v17 = vrot.slane %v251_v8, 4  ;;  %v296_v18 = vshll.u32 %v1181_v9, 16  ;;  %v1197_v19 = vld [vmem:[%s1164_s7 + $0x30] sm:$0xf] }
  0x1f   : > { %v256_v20 = vrot.slane %v254_v10, 5  ;;  %v824_v21 = vcombine.low %v1173_v4, %v1181_v9  ;;  %v321_v22 = vshrl.u32 %v1197_v19, 16  ;;  %v324_v23 = vshll.u32 %v1197_v19, 16  ;;  %v1204_v24 = vld [vmem:[%s1164_s7 + $0x38] sm:$0xf] }
  0x20   : > { %v825_v25 = vcombine.low %v1188_v14, %v1197_v19  ;;  %v307_v26 = vshrl.u32 %v1188_v14, 16  ;;  %v310_v27 = vshll.u32 %v1188_v14, 16  ;;  %v231_v28 = vld [vmem:[%s1164_s7 + $0x40] sm:$0xf]  ;;  %v335_v29 = vshrl.u32 %v1204_v24, 16  ;;  %v987_v6 = vld [vmem:[%s1368_s1 + $0x18] sm:$0xff]  }
  0x21   : > { %v1212_v30 = vrot.slane %v321_v22, 4  ;;  %v1214_v31 = vrot.slane %v324_v23, 5  ;;  %v338_v32 = vshll.u32 %v1204_v24, 16  ;;  %v349_v33 = vshrl.u32 %v231_v28, 16  ;;  %v1218_v34 = vld [vmem:[%s1164_s7] sm:$0xf]  ;;  %899 = vmatprep.subr.bf16.mxu0 %v987_v6  ;;  %912 = vmatprep.subr.bf16.mxu1 %v987_v6 }
  0x22   : > { %410 = vrot.lane.b32.xlu1 %v824_v21, %s1072_s8  ;;  %412 = vrot.lane.b32.xlu0 %v825_v25, %s1072_s8  ;;  %v1222_v35 = vrot.slane %v307_v26, 4  ;;  %v1224_v36 = vrot.slane %v310_v27, 5  ;;  %v352_v37 = vshll.u32 %v231_v28, 16  ;;  %v826_v38 = vcombine.low %v1204_v24, %v231_v28  ;;  %v216_v39 = vld [vmem:[%s1164_s7 + $0x4] sm:$0x1] }
  0x23   : > { %v1231_v41 = vrot.slane %v349_v33, 4  ;;  %v218_v42 = vld [vmem:[%s1164_s7 + $0xc] sm:$0x1]  ;;  %v237_v43 = vshrl.u32 %v1218_v34, 16  ;;  %v240_v44 = vshll.u32 %v1218_v34, 16  ;;  %v246_v45 = vshll.u32 %v216_v39, 16  ;;  %900 = vmatpush3.bf16.msra.mxu0 %v987_v6  ;;  %916 = vmatpush3.bf16.msra.mxu1 %v987_v6 }
  0x24   : > { %v1236_v46 = vrot.slane %v352_v37, 5  ;;  %v257_v47 = vor.u32 %v256_v20, %v253_v17  ;;  %v260_v48 = vshll.u32 %v218_v42, 16  ;;  %v222_v49 = vld [vmem:[%s1164_s7 + $0x1c] sm:$0x1]  ;;  %v224_v50 = vld [vmem:[%s1164_s7 + $0x24] sm:$0x1]  ;;  %v271_v51 = vor.u32 %v1192_v16, %v1190_v15 }
  0x25   : > { %v239_v53 = vrot.slane %v237_v43, 4  ;;  %v242_v54 = vrot.slane %v240_v44, 5  ;;  %v248_v55 = vrot.slane %v246_v45, 5  ;;  %v281_v56 = vrot.slane %v279_v11, 4  ;;  %v220_v61 = vld [vmem:[%s1164_s7 + $0x14] sm:$0x1] }
  0x26   : > { %414 = vrot.lane.b32.xlu1 %v826_v38, %s1072_s8  ;;  %v258_v57 = vrot.slane %v257_v47, 4  ;;  %v262_v58 = vrot.slane %v260_v48, 5  ;;  %v284_v59 = vrot.slane %v282_v12, 5  ;;  %v288_v60 = vshll.u32 %v222_v49, 16  ;;  %v228_v5 = vld [vmem:[%s1164_s7 + $0x34] sm:$0x1] }
  0x27   : > { %v243_v62 = vor.u32 %v242_v54, %v239_v53  ;;  %v295_v63 = vrot.slane %v293_v13, 4  ;;  %v298_v0 = vrot.slane %v296_v18, 5  ;;  %v302_v1 = vshll.u32 %v224_v50, 16  ;;  %v230_v18 = vld [vmem:[%s1164_s7 + $0x3c] sm:$0x1]  ;;  %s992_s8 = scalar_lea.vmem %s1319_s4, 512 }
  0x28   : > { %v263_v7 = vsel %vm1244_vm2, %v258_v57, %v262_v58  ;;  %v285_v8 = vor.u32 %v284_v59, %v281_v56  ;;  %v290_v10 = vrot.slane %v288_v60, 5  ;;  %v272_v11 = vrot.slane %v271_v51, 4  ;;  %v232_v39 = vld [vmem:[%s1164_s7 + $0x44] sm:$0x1]  ;;  %v226_v42 = vld [vmem:[%s1164_s7 + $0x2c] sm:$0x1]  ;;  %s1317_s7 = scalar_lea.hbm %s1370_s3, %s861_s29  ;;  %p993_p12 = scmp.ne.s32.totalorder %s1319_s4, %s992_s8 }
  0x29   : > { %v244_v15 = vrot.slane %v243_v62, 4  ;;  %v299_v12 = vor.u32 %v298_v0, %v295_v63  ;;  %v304_v16 = vrot.slane %v302_v1, 5  ;;  %v274_v17 = vshll.u32 %v220_v61, 16  ;;  %p1000_p2 = scmp.lt.s32.totalorder %s998_s11, %s992_s8 }
  0x2a   : > { %v286_v13 = vrot.slane %v285_v8, 4  ;;  %v327_v20 = vor.u32 %v1214_v31, %v1212_v30  ;;  %v330_v21 = vshll.u32 %v228_v5, 16  ;;  %v337_v22 = vrot.slane %v335_v29, 4  ;;  %p994_p13 = pnand %p993_p12, %p1138_p4 }
  0x2b   : > { %v249_v23 = vsel %vm1244_vm2, %v244_v15, %v248_v55  ;;  %v300_v25 = vrot.slane %v299_v12, 4  ;;  %v276_v26 = vrot.slane %v274_v17, 5  ;;  %v340_v27 = vrot.slane %v338_v32, 5  ;;  %p1001_p3 = por %p1000_p2, %p999_p1 }
  0x2c   : > { %v819_v28 = vcombine.low %v249_v23, %v263_v7  ;;  %v291_v33 = vsel %vm1244_vm2, %v286_v13, %v290_v10  ;;  %v328_v37 = vrot.slane %v327_v20, 4  ;;  %v332_v38 = vrot.slane %v330_v21, 5  ;;  %p995_p0 = pneg %p994_p13 }
  0x2d   : > { %v305_v30 = vsel %vm1244_vm2, %v300_v25, %v304_v16  ;;  %v277_v29 = vsel %vm1244_vm2, %v272_v11, %v276_v26  ;;  %v341_v31 = vor.u32 %v340_v27, %v337_v22  ;;  %v344_v40 = vshll.u32 %v230_v18, 16  ;;  %v831_v22 = vld [vmem:[%s1369_s2] ss:$0 sm:$0xff] }
  0x2e   : > { %394 = vrot.lane.b32.xlu0 %v819_v28, %s1073_s19  ;;  %v828_v32 = vcombine.low %v291_v33, %v305_v30  ;;  %v820_v43 = vcombine.low %v277_v29, %v291_v33  ;;  %v333_v44 = vsel %vm1244_vm2, %v328_v37, %v332_v38  ;;  %v355_v48 = vor.u32 %v1236_v46, %v1231_v41  ;;  %p1002_p5 = pnand %p1001_p3, %p995_p0 }
  0x2f   : > { %v342_v45 = vrot.slane %v341_v31, 4  ;;  %v346_v47 = vrot.slane %v344_v40, 5  ;;  %v358_v49 = vshll.u32 %v232_v39, 16  ;;  %v313_v50 = vor.u32 %v1224_v36, %v1222_v35 }
  0x30   : > { %423 = vrot.lane.b32.xlu1 %v828_v32, %s1074_s21  ;;  %v316_v51 = vshll.u32 %v226_v42, 16  ;;  %v815_v53 = vcombine.low %v1218_v34, %v1167_v2  ;;  %v816_v54 = vcombine.low %v1170_v3, %v1173_v4  ;;  %v827_v56 = vcombine.low %v263_v7, %v277_v29 }
  0x31   : > { %v347_v55 = vsel %vm1244_vm2, %v342_v45, %v346_v47  ;;  %v356_v57 = vrot.slane %v355_v48, 4  ;;  %v360_v58 = vrot.slane %v358_v49, 5  ;;  %v314_v46 = vrot.slane %v313_v50, 4 }
  0x32   : > { %396 = vrot.lane.b32.xlu0 %v820_v43, %s1073_s19  ;;  %v822_v41 = vcombine.low %v333_v44, %v347_v55  ;;  %v318_v59 = vrot.slane %v316_v51, 5  ;;  %v818_v35 = vcombine.low %v1197_v19, %v1204_v24  ;;  %v817_v3 = vcombine.low %v1181_v9, %v1188_v14 }
  0x33   : > { %v361_v2 = vsel %vm1244_vm2, %v356_v57, %v360_v58 }
  0x34   : > { %400 = vrot.lane.b32.xlu1 %v822_v41, %s1073_s19  ;;  %v830_v4 = vcombine.low %v347_v55, %v361_v2  ;;  %v319_v34 = vsel %vm1244_vm2, %v314_v46, %v318_v59 }
  0x35   : > { %v821_v36 = vcombine.low %v305_v30, %v319_v34  ;;  %v829_v60 = vcombine.low %v319_v34, %v333_v44 }
  0x36   : > { %421 = vrot.lane.b32.xlu0 %v827_v56, %s1074_s21 }
  0x38   : > { %427 = vrot.lane.b32.xlu1 %v830_v4, %s1074_s21 }
  0x3a   : > { %398 = vrot.lane.b32.xlu0 %v821_v36, %s1073_s19 }
  0x3e   : > { %425 = vrot.lane.b32.xlu0 %v829_v60, %s1074_s21 }
  0x90   : > { %v409_v19 = vpop.permute.xlu1 %408 }
  0x94   : > { %v411_v24 = vpop.permute.xlu1 %410  ;;  %v413_v61 = vpop.permute.xlu0 %412 }
  0x98   : > { %v415_v62 = vpop.permute.xlu1 %414 }
  0xa0   : > { %v395_v63 = vpop.permute.xlu0 %394 }
  0xa1   : > { %v432_v0 = vsel %vm429_vm3, %v815_v53, %v395_v63 }
  0xa2   : > { %v424_v9 = vpop.permute.xlu1 %423  ;;  %v444_v6 = vsel %vm442_vm4, %v432_v0, %v409_v19 }
  0xa4   : > { %v397_v14 = vpop.permute.xlu0 %396 }
  0xa5   : > { %v435_v52 = vsel %vm429_vm3, %v816_v54, %v397_v14 }
  0xa6   : > { %v446_v1 = vsel %vm442_vm4, %v435_v52, %v411_v24  ;;  %v401_v7 = vpop.permute.xlu1 %400 }
  0xa7   : > { %v455_v10 = vsel %vm451_vm5, %v446_v1, %v424_v9  ;;  %v441_v12 = vsel %vm429_vm3, %v818_v35, %v401_v7 }
  0xa8   : > { %v422_v5 = vpop.permute.xlu0 %421  ;;  %v450_v18 = vsel %vm442_vm4, %v441_v12, %v415_v62 }
  0xa9   : > { %v453_v8 = vsel %vm451_vm5, %v444_v6, %v422_v5 }
  0xaa   : > { %901 = vmatprep.mubr.msk.bf16.mxu0 %vm499_vm6, %v453_v8  ;;  %v428_v16 = vpop.permute.xlu1 %427 }
  0xab   : > { %902 = vmatmul.mubr.msk.bf16.vlgmr.msra.gmra.mrb[0].mxu0 %vm499_vm6, %v455_v10  ;;  %v459_v21 = vsel %vm451_vm5, %v450_v18, %v428_v16 }
  0xac   : > { %v399_v11 = vpop.permute.xlu0 %398 }
  0xad   : > { %v438_v15 = vsel %vm429_vm3, %v817_v3, %v399_v11 }
  0xae   : > { %v448_v13 = vsel %vm442_vm4, %v438_v15, %v413_v61 }
  0xb0   : > { %v426_v17 = vpop.permute.xlu0 %425 }
  0xb1   : > { %v457_v20 = vsel %vm451_vm5, %v448_v13, %v426_v17 }
  0xb2   : > { %905 = vmatprep.mubr.msk.bf16.mxu1 %vm499_vm6, %v457_v20 }
  0xb3   : > { %906 = vmatmul.mubr.msk.bf16.vlgmr.msra.gmra.mrb[0].mxu1 %vm499_vm6, %v459_v21 }
 0x17e   : > { %v903_v23 = vpop.f32.mrb[0].mxu0 }
 0x17f   : > { %v542_v25 = vpop.f32.mrb[1].mxu0  ;;  %v551_v33 = vadd.f32 %v903_v23, %v831_v22 }
 0x180   : > { %v543_v26 = vadd.f32 %v831_v22, %v542_v25  ;;  %v904_v27 = vpop.f32.mrb[2].mxu0 }
 0x181   : > { %v545_v28 = vpop.f32.mrb[3].mxu0  ;;  %v554_v39 = vadd.f32 %v904_v27, %v831_v22  ;;  %v575_v29 = vmax.f32 %v551_v33, 0.0 }
 0x182   : > { %v546_v37 = vadd.f32 %v831_v22, %v545_v28  ;;  %v573_v38 = vmax.f32 %v543_v26, 0.0 }
 0x183   : > { %v576_v32 = vmax.f32 %v554_v39, 0.0 }
 0x184   : > { %v574_v30 = vmax.f32 %v546_v37, 0.0 }
 0x186   : > { %v597_v31 = vadd.f32 %v574_v30, %v573_v38  ;;  %v907_v40 = vpop.f32.mrb[0].mxu1 }
 0x187   : > { %v558_v42 = vpop.f32.mrb[1].mxu1  ;;  %v567_v48 = vadd.f32 %v907_v40, %v831_v22 }
 0x188   : > { %v598_v43 = vadd.f32 %v597_v31, %v575_v29  ;;  %v559_v44 = vadd.f32 %v831_v22, %v558_v42  ;;  %v908_v45 = vpop.f32.mrb[2].mxu1 }
 0x189   : > { %v561_v47 = vpop.f32.mrb[3].mxu1  ;;  %v570_v54 = vadd.f32 %v908_v45, %v831_v22  ;;  %v579_v56 = vmax.f32 %v567_v48, 0.0 }
 0x18a   : > { %v577_v49 = vmax.f32 %v559_v44, 0.0  ;;  %v599_v50 = vadd.f32 %v598_v43, %v576_v32  ;;  %v562_v51 = vadd.f32 %v831_v22, %v561_v47 }
 0x18b   : > { %v580_v58 = vmax.f32 %v570_v54, 0.0 }
 0x18c   : > { %v600_v53 = vadd.f32 %v599_v50, %v577_v49  ;;  %v578_v55 = vmax.f32 %v562_v51, 0.0 }
 0x18e   : > { %v601_v57 = vadd.f32 %v600_v53, %v578_v55 }
 0x190   : > { %v602_v41 = vadd.f32 %v601_v57, %v579_v56 }
 0x192   : > { %v603_v46 = vadd.f32 %v602_v41, %v580_v58 }
 0x194   : > { %v604_v59 = vrot.slane %v603_v46, 4 }
 0x196   : > { %v605_v35 = vadd.f32 %v604_v59, %v603_v46 }
 0x198   : > { %v606_v2 = vrot.slane %v605_v35, 2 }
 0x19a   : > { %v607_v3 = vadd.f32 %v606_v2, %v605_v35 }
 0x19c   : > { %v608_v4 = vrot.slane %v607_v3, 1 }
 0x19e   : > { %v609_v34 = vadd.f32 %v608_v4, %v607_v3 }
 0x1a0   : > { %v611_v36 = vmul.f32 0.015625, %v609_v34 }
 0x1a2   : > { %v612_v60 = vsub.f32 %v573_v38, %v611_v36  ;;  %v613_v19 = vsub.f32 %v574_v30, %v611_v36  ;;  %v614_v24 = vsub.f32 %v575_v29, %v611_v36  ;;  %v615_v61 = vsub.f32 %v576_v32, %v611_v36 }
 0x1a3   : > { %v616_v62 = vsub.f32 %v577_v49, %v611_v36  ;;  %v617_v63 = vsub.f32 %v578_v55, %v611_v36  ;;  %v618_v9 = vsub.f32 %v579_v56, %v611_v36  ;;  %v619_v14 = vsub.f32 %v580_v58, %v611_v36 }
 0x1a4   : > { %v620_v0 = vmul.f32 %v612_v60, %v612_v60  ;;  %v621_v52 = vmul.f32 %v613_v19, %v613_v19  ;;  %v622_v1 = vmul.f32 %v614_v24, %v614_v24  ;;  %v623_v6 = vmul.f32 %v615_v61, %v615_v61 }
 0x1a5   : > { %v624_v8 = vmul.f32 %v616_v62, %v616_v62  ;;  %v625_v11 = vmul.f32 %v617_v63, %v617_v63  ;;  %v626_v12 = vmul.f32 %v618_v9, %v618_v9  ;;  %v627_v17 = vmul.f32 %v619_v14, %v619_v14 }
 0x1a6   : > { %v628_v5 = vadd.f32 %v621_v52, %v620_v0 }
 0x1a8   : > { %v629_v7 = vadd.f32 %v628_v5, %v622_v1 }
 0x1aa   : > { %v630_v10 = vadd.f32 %v629_v7, %v623_v6 }
 0x1ac   : > { %v631_v15 = vadd.f32 %v630_v10, %v624_v8 }
 0x1ae   : > { %v632_v16 = vadd.f32 %v631_v15, %v625_v11 }
 0x1b0   : > { %v633_v13 = vadd.f32 %v632_v16, %v626_v12 }
 0x1b2   : > { %v634_v18 = vadd.f32 %v633_v13, %v627_v17 }
 0x1b4   : > { %v635_v20 = vrot.slane %v634_v18, 4 }
 0x1b6   : > { %v636_v21 = vadd.f32 %v635_v20, %v634_v18 }
 0x1b8   : > { %v637_v22 = vrot.slane %v636_v21, 2 }
 0x1ba   : > { %v638_v23 = vadd.f32 %v637_v22, %v636_v21 }
 0x1bc   : > { %v639_v25 = vrot.slane %v638_v23, 1 }
 0x1be   : > { %v640_v26 = vadd.f32 %v639_v25, %v638_v23 }
 0x1c0   : > { %v641_v27 = vmul.f32 0.015625, %v640_v26 }
 0x1c2   : > { %v642_v28 = vadd.f32 1e-05, %v641_v27 }
 0x1c4   : > { %990 = vrsqrt.f32 %v642_v28 }
 0x1ce   : > { %v991_v33 = vpop.eup %990 }
 0x1cf   : > { %v644_v37 = vmul.f32 %v991_v33, %v612_v60  ;;  %v645_v38 = vmul.f32 %v991_v33, %v613_v19  ;;  %v646_v39 = vmul.f32 %v991_v33, %v614_v24  ;;  %v647_v30 = vmul.f32 %v991_v33, %v615_v61 }
 0x1d0   : > { %v648_v29 = vmul.f32 %v991_v33, %v616_v62  ;;  %v649_v31 = vmul.f32 %v991_v33, %v617_v63  ;;  %v650_v40 = vmul.f32 %v991_v33, %v618_v9  ;;  %v651_v42 = vmul.f32 %v991_v33, %v619_v14 }
 0x1d1   : > { %v870_v32 = vpack.c.bf16 %v647_v30, %v646_v39  ;;  %v865_v43 = vpack.c.bf16 %v645_v38, %v644_v37 }
 0x1d2   : > { %v875_v44 = vpack.c.bf16 %v649_v31, %v648_v29  ;;  %v880_v45 = vpack.c.bf16 %v651_v42, %v650_v40 }
 0x1d3   : > { %882 = vst [vmem:[%s201_s30 + $0x8] sm:$0xff] %v870_v32   ;;  %866 = vst [vmem:[%s201_s30] sm:$0xff] %v865_v43  }
 0x1d4   : > { %883 = vst [vmem:[%s201_s30 + $0x10] sm:$0xff] %v875_v44   ;;  %884 = vst [vmem:[%s201_s30 + $0x18] sm:$0xff] %v880_v45  }
 0x1d5   : > { %1005 = shalt.err (!%p1002_p5)
}
 0x1d6   : > { %s1006_s18 = scalar_lea.hbm %s1317_s7, 512  ;;  %s1010_s23 = scalar_lea.hbm %s1370_s3, 1024 }
 0x1d7   : > { %p1007_p6 = scmp.ne.s32.totalorder %s1317_s7, %s1006_s18  ;;  %p1011_p10 = scmp.lt.u32.totalorder %s1317_s7, %s1370_s3 }
 0x1d8   : > { %p1012_p11 = scmp.lt.u32.totalorder %s1010_s23, %s1006_s18  ;;  %p1014_p13 = scmp.lt.u32.totalorder %s1006_s18, %s1317_s7 }
 0x1d9   : > { %p1008_p7 = pnand %p1007_p6, %p1138_p4 }
 0x1da   : > { %p1013_p12 = por %p1012_p11, %p1011_p10 }
 0x1db   : > { %p1009_p9 = pneg %p1008_p7 }
 0x1dc   : > { %p1015_p0 = por %p1014_p13, %p1013_p12 }
 0x1de   : > { %p1016_p1 = pnand %p1015_p0, %p1009_p9 }
 0x1e0   : > { %1019 = shalt.err (!%p1016_p1)
}
 0x1e1   : > { %s1076_s28 = smov 64   ;;  %s1077_s29 = smov 4  }
 0x1e2   : > { %918 = dma.vmem_to_hbm [thread:$0]  (%p1138_p4), %s1319_s4, 512, %s1317_s7, %s1321_s15, %s1076_s28, %s1076_s28, %s1077_s29  }
 0x1e3 PF: > { %p924_p2 = scmp.ge.s32.totalorder %s1070_s17, 2  ;;  %s722_s30 = sand.u32 1, %s1050_s12  }
 0x1e4   : > { %s723_s5 = scalar_lea.sflag [#allocation4], %s722_s30 }
 0x1e5   : > { %p921_p3 = pnand %p924_p2, %p1145_p8 }
 0x1e7   : > { %1045 = dma.done.wait (!%p921_p3), %s723_s5, 512  }
 0x1e8   : > { %1047 = vsyncadd (!%p921_p3), %s723_s5, 4294966784  ;;  %s16_s17 = sadd.s32 1, %s1070_s17   ;;  %s1375_s12 = smov %s1054_s13 }
 0x1e9   : > { %p13_p5 = scmp.ge.s32.totalorder %s16_s17, 4   ;;  %s1376_s13 = smov %s1058_s14 }
 0x1ea   : > { %s1377_s14 = smov %s1151_s25  ;;  %s1378_s15 = smov %s1066_s16 }
 0x1eb   : > { %s1379_s16 = smov %s1381_s20  ;;  %15 = sbr.rel (!%p13_p5) target bundleno = 4 (0x4), region = 73 }
 0x1f2   :  { %728 = vsyncpa [#allocation4], 1 }
 0x1f3   :  { %730 = vsyncpa [#allocation4 + $0x1], 1 }

// kernel: tpu_custom_call.1
= control target key start
LH: loop header
LB: loop body
LE: loop exit
PB: predicated region body
PF: predicated region fallthrough
CT: control target
= control target key end

     0   :  { %8 = vsyncpa [#allocation4], 0  ;;  %s1605_s0 = inlined_call_operand.vmem [shape: bf16[2,9,9,16], index: 0, kind: input, shape index: {}]   ;;  %s1606_s1 = inlined_call_operand.vmem [shape: bf16[64,128], index: 1, kind: input, shape index: {}]   ;;  %s1607_s2 = inlined_call_operand.vmem [shape: f32[1,128], index: 2, kind: input, shape index: {}]   ;;  %s1608_s3 = inlined_call_operand.hbm [shape: bf16[2,64,128], index: 3, kind: output, shape index: {}]  }
   0x1   :  { %10 = vsyncpa [#allocation4 + $0x1], 0  ;;  %s1360_s12 = smov 0   ;;  %s1362_s13 = smov 0  }
   0x2   :  { %s1364_s14 = smov 0   ;;  %s1366_s15 = smov 0  }
   0x3   :  { %s1368_s16 = smov 0   ;;  %s1370_s17 = smov 0  }
   0x4 LB: > { %s1010_s18 = sadd.s32 4294967295, %s1335_s17   ;;  %s1011_s19 = sadd.s32 4294967294, %s1335_s17   ;;  %s1335_s17 = sphi %s1370_s17, %s16_s17   ;;  %s1331_s16 = sphi %s1368_s16, %s1617_s16   ;;  %s1327_s15 = sphi %s1366_s15, %s1616_s15   ;;  %s1323_s14 = sphi %s1364_s14, %s1615_s14   ;;  %s1319_s13 = sphi %s1362_s13, %s1614_s13   ;;  %s1315_s12 = sphi %s1360_s12, %s1613_s12  }
   0x5   : > { %s28_s20 = sadd.s32 1, %s1331_s16  ;;  %s115_s21 = sadd.s32 1, %s1323_s14 }
   0x6   : > { %p30_p0 = scmp.ge.s32.totalorder %s28_s20, 2  ;;  %p125_p1 = scmp.ne.s32.totalorder %s1323_s14, %s1319_s13 }
   0x7   : > { %p126_p2 = scmp.eq.s32.totalorder %s1010_s18, 1  ;;  %p131_p3 = scmp.ne.s32.totalorder %s1319_s13, %s1315_s12 }
   0x8   : > { %s1619_s20 = smov (%p30_p0, %s28_s20), 0  ;;  %p132_p5 = scmp.eq.s32.totalorder %s1011_s19, 1 }
   0x9   : > { %p1400_p4 = por %p126_p2, %p125_p1  ;;  %s110_s23 = ssub.s32 %s1331_s16, %s1619_s20 }
   0xa   : > { %p1016_p6 = scmp.ge.s32.totalorder %s1335_s17, 1  ;;  %p113_p7 = scmp.eq.s32.totalorder %s110_s23, 0 }
   0xb   : > { %p1407_p8 = por %p132_p5, %p131_p3  ;;  %p171_p9 = scmp.lt.s32.totalorder %s1335_s17, 3 }
   0xc   : > { %s1413_s25 = scalar_select %p113_p7, %s1323_s14, %s115_s21  }
   0xd   : > { %p172_p10 = pnand %p1016_p6, %p171_p9 }
   0xe   : > { %v1243_v0 = vld [vmem:[%s1606_s1 + $0x10] sm:$0xff] (!%p172_p10)   ;;  %p202_p11 = scmp.lt.s32.totalorder (!%p172_p10), %s1327_s15, 1  ;;  %v1247_v1 = vld [vmem:[%s1606_s1 + $0x8] sm:$0xff] (!%p172_p10)   ;;  %v1426_v2 = vld [vmem:[%s1606_s1] sm:$0xff] (!%p172_p10)   ;;  %vm384_vm0 = vcmask (!%p172_p10), 130048   ;;  %s199_s21 = sand.u32 (!%p172_p10), 1, %s1319_s13  }
   0xf   : > { %175 = sbr.rel (%p172_p10) target bundleno = 377 (0x179), region = 32  ;;  %1141 = vmatprep.subr.bf16.mxu0 (!%p172_p10), %v1243_v0  ;;  %1121 = vmatprep.subr.bf16.mxu1 (!%p172_p10), %v1247_v1  ;;  %v1251_v3 = vld [vmem:[%s1606_s1 + $0x18] sm:$0xff] (!%p172_p10)   ;;  %vm233_vm1 = vsmask.f32 (!%p172_p10), 3328  ;;  %vm234_vm2 = vsmask.f32 (!%p172_p10), 7440 }
  0x10   : > { %1142 = vmatpush3.bf16.msra.mxu0 (!%p172_p10), %v1243_v0  ;;  %1122 = vmatpush3.bf16.msra.mxu1 (!%p172_p10), %v1247_v1  ;;  %vm1486_vm3 = vmor (!%p172_p10), %vm233_vm1, %vm234_vm2  ;;  %s1017_s23 = sshll.u32 (!%p172_p10), %s199_s21, 5  ;;  %s1077_s26 = sshll.u32 (!%p172_p10), %s1327_s15, 9 }
  0x11   : > { %1131 = vmatprep.subr.bf16.mxu1 (!%p172_p10), %v1426_v2  ;;  %1151 = vmatprep.subr.bf16.mxu0 (!%p172_p10), %v1251_v3  ;;  %s201_s27 = scalar_lea.vmem (!%p172_p10), [#allocation3], %s1017_s23  ;;  %s1555_s4 = scalar_lea.hbm (!%p172_p10), %s1608_s3, %s1077_s26 }
  0x12   : > { %s911_s28 = sshll.u32 (!%p172_p10), %s201_s27, 4  ;;  %s1557_s28 = int_to_ptr.vmem [resolvable:$true] %s911_s28 }
  0x13   : > { %s1257_s5 = scalar_lea.vmem (!%p172_p10), %s1557_s28, 512 }
  0x14   : > { %p1258_p12 = scmp.ne.s32.totalorder (!%p172_p10), %s1557_s28, %s1257_s5 }
  0x16   : > { %s203_s30 = scalar_select %p202_p11, %s1327_s15, 1 }
  0x17   : > { %s1559_s15 = scalar_lea.sflag [#allocation4], %s199_s21  ;;  %p1259_p13 = pnand %p1258_p12, %p1400_p4 }
  0x18   : > { %s1185_s6 = smul.u32 72, %s203_s30 }
  0x19   : > { %p1260_p0 = pneg %p1259_p13 }
  0x1a   : > { %s1435_s11 = scalar_lea.vmem %s1605_s0, %s1185_s6  ;;  %s1337_s6 = smov [#allocation3]  }
  0x1b   : > { %v1438_v4 = vld [vmem:[%s1435_s11 + $0x8] sm:$0xf]  ;;  %v1441_v5 = vld [vmem:[%s1435_s11 + $0x10] sm:$0xf]  ;;  %v1444_v6 = vld [vmem:[%s1435_s11 + $0x18] sm:$0xf] }
  0x1c   : > { %v265_v7 = vshrl.u32 %v1441_v5, 16  ;;  %v268_v8 = vshll.u32 %v1441_v5, 16  ;;  %v1449_v9 = vld [vmem:[%s1435_s11 + $0x20] sm:$0xf]  ;;  %v251_v10 = vshrl.u32 %v1438_v4, 16  ;;  %v254_v11 = vshll.u32 %v1438_v4, 16 }
  0x1d   : > { %v1037_v12 = vcombine.low %v1438_v4, %v1441_v5  ;;  %v1456_v13 = vld [vmem:[%s1435_s11 + $0x28] sm:$0xf]  ;;  %v1459_v14 = vld [vmem:[%s1435_s11 + $0x30] sm:$0xf]  ;;  %v293_v17 = vshrl.u32 %v1449_v9, 16  ;;  %v1038_v18 = vcombine.low %v1444_v6, %v1449_v9  ;;  %v296_v20 = vshll.u32 %v1449_v9, 16 }
  0x1e   : > { %v267_v15 = vrot.slane %v265_v7, 4  ;;  %v270_v16 = vrot.slane %v268_v8, 5  ;;  %v1465_v19 = vld [vmem:[%s1435_s11] sm:$0xf]  ;;  %v307_v21 = vshrl.u32 %v1456_v13, 16  ;;  %v310_v22 = vshll.u32 %v1456_v13, 16 }
  0x1f   : > { %1143 = vmatprep.mubr.msk.bf16.mxu0 %vm384_vm0, %v1037_v12  ;;  %v1039_v23 = vcombine.low %v1456_v13, %v1459_v14  ;;  %v216_v24 = vld [vmem:[%s1435_s11 + $0x4] sm:$0x1]  ;;  %v321_v25 = vshrl.u32 %v1459_v14, 16  ;;  %v324_v26 = vshll.u32 %v1459_v14, 16  ;;  %v218_v27 = vld [vmem:[%s1435_s11 + $0xc] sm:$0x1] }
  0x20   : > { %1144 = vmatmul.mubr.msk.bf16.vlgmr.msra.gmra.mrb[0].mxu0 %vm384_vm0, %v1038_v18  ;;  %v220_v28 = vld [vmem:[%s1435_s11 + $0x14] sm:$0x1]  ;;  %v271_v29 = vor.u32 %v270_v16, %v267_v15  ;;  %v237_v30 = vshrl.u32 %v1465_v19, 16  ;;  %v240_v31 = vshll.u32 %v1465_v19, 16  ;;  %v246_v32 = vshll.u32 %v216_v24, 16  ;;  %s1261_s7 = sshll.u32 %s1337_s6, 4  ;;  %s1262_s7 = int_to_ptr.vmem [resolvable:$false] %s1261_s7 }
  0x21   : > { %1147 = vmatprep.mubr.msk.bf16.mxu0 %vm384_vm0, %v1039_v23  ;;  %v253_v33 = vrot.slane %v251_v10, 4  ;;  %1152 = vmatpush3.bf16.msra.mxu0 %v1251_v3  ;;  %v222_v34 = vld [vmem:[%s1435_s11 + $0x1c] sm:$0x1]  ;;  %v256_v35 = vrot.slane %v254_v11, 5  ;;  %v260_v36 = vshll.u32 %v218_v27, 16  ;;  %v274_v38 = vshll.u32 %v220_v28, 16  ;;  %p1264_p1 = scmp.lt.s32.totalorder %s1557_s28, %s1262_s7 }
  0x22   : > { %v272_v37 = vrot.slane %v271_v29, 4  ;;  %v224_v39 = vld [vmem:[%s1435_s11 + $0x24] sm:$0x1]  ;;  %v239_v41 = vrot.slane %v237_v30, 4  ;;  %v242_v42 = vrot.slane %v240_v31, 5  ;;  %v248_v43 = vrot.slane %v246_v32, 5 }
  0x23   : > { %v279_v44 = vshrl.u32 %v1444_v6, 16  ;;  %v257_v45 = vor.u32 %v256_v35, %v253_v33  ;;  %v262_v46 = vrot.slane %v260_v36, 5  ;;  %v276_v47 = vrot.slane %v274_v38, 5  ;;  %v1493_v49 = vld [vmem:[%s1435_s11 + $0x38] sm:$0xf]  ;;  %s1263_s8 = scalar_lea.vmem %s1262_s7, 1024 }
  0x24   : > { %v282_v48 = vshll.u32 %v1444_v6, 16  ;;  %v243_v50 = vor.u32 %v242_v42, %v239_v41  ;;  %v288_v52 = vshll.u32 %v222_v34, 16  ;;  %v295_v53 = vrot.slane %v293_v17, 4  ;;  %v231_v1 = vld [vmem:[%s1435_s11 + $0x40] sm:$0xf]  ;;  %p1265_p2 = scmp.lt.s32.totalorder %s1263_s8, %s1257_s5 }
  0x25   : > { %v281_v51 = vrot.slane %v279_v44, 4  ;;  %v258_v54 = vrot.slane %v257_v45, 4  ;;  %v277_v55 = vsel %vm1486_vm3, %v272_v37, %v276_v47  ;;  %v298_v57 = vrot.slane %v296_v20, 5  ;;  %v226_v12 = vld [vmem:[%s1435_s11 + $0x2c] sm:$0x1] }
  0x26   : > { %v284_v56 = vrot.slane %v282_v48, 5  ;;  %v244_v58 = vrot.slane %v243_v50, 4  ;;  %v290_v59 = vrot.slane %v288_v52, 5  ;;  %v302_v60 = vshll.u32 %v224_v39, 16  ;;  %v228_v28 = vld [vmem:[%s1435_s11 + $0x34] sm:$0x1]  ;;  %p1266_p3 = por %p1265_p2, %p1264_p1 }
  0x27   : > { %v335_v61 = vshrl.u32 %v1493_v49, 16  ;;  %v263_v62 = vsel %vm1486_vm3, %v258_v54, %v262_v46  ;;  %v299_v0 = vor.u32 %v298_v57, %v295_v53  ;;  %v338_v3 = vshll.u32 %v1493_v49, 16  ;;  %v230_v32 = vld [vmem:[%s1435_s11 + $0x3c] sm:$0x1] }
  0x28   : > { %v285_v63 = vor.u32 %v284_v56, %v281_v51  ;;  %v249_v7 = vsel %vm1486_vm3, %v244_v58, %v248_v43  ;;  %v304_v8 = vrot.slane %v302_v60, 5  ;;  %v1046_v10 = vcombine.low %v263_v62, %v277_v55  ;;  %p1267_p5 = pnand %p1266_p3, %p1260_p0 }
  0x29   : > { %v349_v11 = vshrl.u32 %v231_v1, 16  ;;  %v300_v16 = vrot.slane %v299_v0, 4  ;;  %v1019_v17 = vcombine.low %v249_v7, %v263_v62  ;;  %v352_v18 = vshll.u32 %v231_v1, 16 }
  0x2a   : > { %v286_v15 = vrot.slane %v285_v63, 4  ;;  %v1040_v23 = vcombine.low %v1493_v49, %v231_v1  ;;  %v309_v24 = vrot.slane %v307_v21, 4  ;;  %v312_v27 = vrot.slane %v310_v22, 5  ;;  %v232_v22 = vld [vmem:[%s1435_s11 + $0x44] sm:$0x1] }
  0x2b   : > { %v351_v20 = vrot.slane %v349_v11, 4  ;;  %1123 = vmatprep.mubr.msk.bf16.mxu1 %vm384_vm0, %v1019_v17  ;;  %v354_v30 = vrot.slane %v352_v18, 5  ;;  %v316_v31 = vshll.u32 %v226_v12, 16  ;;  %v305_v33 = vsel %vm1486_vm3, %v300_v16, %v304_v8 }
  0x2c   : > { %v291_v29 = vsel %vm1486_vm3, %v286_v15, %v290_v59  ;;  %1148 = vmatmul.mubr.msk.bf16.gmra.mrb[4].mxu0 %vm384_vm0, %v1040_v23  ;;  %v313_v35 = vor.u32 %v312_v27, %v309_v24  ;;  %v323_v21 = vrot.slane %v321_v25, 4  ;;  %v326_v37 = vrot.slane %v324_v26, 5 }
  0x2d   : > { %v1020_v34 = vcombine.low %v277_v55, %v291_v29  ;;  %1153 = vmatprep.mubr.msk.bf16.mxu0 %vm384_vm0, %v1046_v10  ;;  %v318_v36 = vrot.slane %v316_v31, 5  ;;  %v330_v38 = vshll.u32 %v228_v28, 16  ;;  %v337_v39 = vrot.slane %v335_v61, 4 }
  0x2e   : > { %v314_v41 = vrot.slane %v313_v35, 4  ;;  %v340_v42 = vrot.slane %v338_v3, 5  ;;  %v344_v43 = vshll.u32 %v230_v32, 16  ;;  %v355_v44 = vor.u32 %v354_v30, %v351_v20 }
  0x2f   : > { %1124 = vmatmul.mubr.msk.bf16.vlgmr.msra.gmra.mrb[0].mxu1 %vm384_vm0, %v1020_v34  ;;  %v327_v45 = vor.u32 %v326_v37, %v323_v21  ;;  %v332_v46 = vrot.slane %v330_v38, 5  ;;  %v358_v25 = vshll.u32 %v232_v22, 16  ;;  %v1047_v47 = vcombine.low %v291_v29, %v305_v33 }
  0x30   : > { %1132 = vmatpush3.bf16.msra.mxu1 %v1426_v2  ;;  %v319_v48 = vsel %vm1486_vm3, %v314_v41, %v318_v36  ;;  %v341_v50 = vor.u32 %v340_v42, %v337_v39  ;;  %v346_v51 = vrot.slane %v344_v43, 5  ;;  %v356_v53 = vrot.slane %v355_v44, 4 }
  0x31   : > { %v1021_v26 = vcombine.low %v305_v33, %v319_v48  ;;  %v328_v52 = vrot.slane %v327_v45, 4  ;;  %v360_v54 = vrot.slane %v358_v25, 5  ;;  %v1028_v58 = vcombine.low %v1465_v19, %v1438_v4 }
  0x32   : > { %v342_v55 = vrot.slane %v341_v50, 4  ;;  %v1029_v62 = vcombine.low %v1441_v5, %v1444_v6  ;;  %v1030_v63 = vcombine.low %v1449_v9, %v1456_v13  ;;  %v1031_v4 = vcombine.low %v1459_v14, %v1493_v49  ;;  %v1055_v9 = vld [vmem:[%s1607_s2] ss:$0 sm:$0xff] }
  0x33   : > { %1127 = vmatprep.mubr.msk.bf16.mxu1 %vm384_vm0, %v1021_v26  ;;  %v333_v56 = vsel %vm1486_vm3, %v328_v52, %v332_v46  ;;  %v361_v60 = vsel %vm1486_vm3, %v356_v53, %v360_v54 }
  0x34   : > { %1154 = vmatmul.mubr.msk.bf16.vlgmr.msra.gmra.mrb[0].mxu0 %vm384_vm0, %v1047_v47  ;;  %v347_v2 = vsel %vm1486_vm3, %v342_v55, %v346_v51  ;;  %v1048_v57 = vcombine.low %v319_v48, %v333_v56 }
  0x35   : > { %v1022_v59 = vcombine.low %v333_v56, %v347_v2  ;;  %v1049_v61 = vcombine.low %v347_v2, %v361_v60 }
  0x36   : > { %1157 = vmatprep.mubr.msk.bf16.mxu0 %vm384_vm0, %v1048_v57 }
  0x37   : > { %1128 = vmatmul.mubr.msk.bf16.gmra.mrb[4].mxu1 %vm384_vm0, %v1022_v59 }
  0x38   : > { %1133 = vmatprep.mubr.msk.bf16.mxu1 %vm384_vm0, %v1028_v58 }
  0x3c   : > { %1158 = vmatmul.mubr.msk.bf16.gmra.mrb[4].mxu0 %vm384_vm0, %v1049_v61 }
  0x3f   : > { %1134 = vmatmul.mubr.msk.bf16.vlgmr.msra.gmra.mrb[0].mxu1 %vm384_vm0, %v1029_v62 }
  0x40   : > { %1137 = vmatprep.mubr.msk.bf16.mxu1 %vm384_vm0, %v1030_v63 }
  0x47   : > { %1138 = vmatmul.mubr.msk.bf16.gmra.mrb[4].mxu1 %vm384_vm0, %v1031_v4 }
 0x107   : > { %v1155_v19 = vpop.f32.mrb[0].mxu0 }
 0x108   : > { %v723_v40 = vpop.f32.mrb[1].mxu0 }
 0x109   : > { %v1156_v0 = vpop.f32.mrb[2].mxu0 }
 0x10a   : > { %v726_v1 = vpop.f32.mrb[3].mxu0 }
 0x10f   : > { %v1159_v3 = vpop.f32.mrb[4].mxu0 }
 0x110   : > { %v739_v5 = vpop.f32.mrb[5].mxu0 }
 0x111   : > { %v1160_v6 = vpop.f32.mrb[6].mxu0 }
 0x112   : > { %v1135_v7 = vpop.f32.mrb[0].mxu1  ;;  %v742_v8 = vpop.f32.mrb[7].mxu0 }
 0x113   : > { %v1161_v10 = vadd.f32 %v1155_v19, %v1135_v7  ;;  %v534_v13 = vpop.f32.mrb[1].mxu1 }
 0x114   : > { %v1162_v11 = vadd.f32 %v723_v40, %v534_v13  ;;  %v1136_v12 = vpop.f32.mrb[2].mxu1 }
 0x115   : > { %v1163_v14 = vadd.f32 %v1156_v0, %v1136_v12  ;;  %v537_v49 = vpop.f32.mrb[3].mxu1  ;;  %v771_v17 = vadd.f32 %v1161_v10, %v1055_v9 }
 0x116   : > { %v769_v15 = vadd.f32 %v1162_v11, %v1055_v9  ;;  %v1164_v16 = vadd.f32 %v726_v1, %v537_v49 }
 0x117   : > { %v772_v23 = vadd.f32 %v1163_v14, %v1055_v9  ;;  %v779_v30 = vmax.f32 %v771_v17, 0.0 }
 0x118   : > { %v770_v18 = vadd.f32 %v1164_v16, %v1055_v9  ;;  %v777_v20 = vmax.f32 %v769_v15, 0.0 }
 0x119   : > { %v780_v21 = vmax.f32 %v772_v23, 0.0 }
 0x11a   : > { %v778_v24 = vmax.f32 %v770_v18, 0.0  ;;  %v1139_v27 = vpop.f32.mrb[4].mxu1 }
 0x11b   : > { %v1165_v28 = vadd.f32 %v1159_v3, %v1139_v27  ;;  %v550_v29 = vpop.f32.mrb[5].mxu1 }
 0x11c   : > { %v801_v31 = vadd.f32 %v778_v24, %v777_v20  ;;  %v1166_v32 = vadd.f32 %v739_v5, %v550_v29  ;;  %v1140_v33 = vpop.f32.mrb[6].mxu1 }
 0x11d   : > { %v1167_v34 = vadd.f32 %v1160_v6, %v1140_v33  ;;  %v553_v35 = vpop.f32.mrb[7].mxu1  ;;  %v775_v38 = vadd.f32 %v1165_v28, %v1055_v9 }
 0x11e   : > { %v802_v22 = vadd.f32 %v801_v31, %v779_v30  ;;  %v773_v36 = vadd.f32 %v1166_v32, %v1055_v9  ;;  %v1168_v37 = vadd.f32 %v742_v8, %v553_v35 }
 0x11f   : > { %v776_v44 = vadd.f32 %v1167_v34, %v1055_v9  ;;  %v783_v46 = vmax.f32 %v775_v38, 0.0 }
 0x120   : > { %v781_v39 = vmax.f32 %v773_v36, 0.0  ;;  %v803_v41 = vadd.f32 %v802_v22, %v780_v21  ;;  %v774_v42 = vadd.f32 %v1168_v37, %v1055_v9 }
 0x121   : > { %v784_v47 = vmax.f32 %v776_v44, 0.0 }
 0x122   : > { %v804_v43 = vadd.f32 %v803_v41, %v781_v39  ;;  %v782_v45 = vmax.f32 %v774_v42, 0.0 }
 0x124   : > { %v805_v25 = vadd.f32 %v804_v43, %v782_v45 }
 0x126   : > { %v806_v48 = vadd.f32 %v805_v25, %v783_v46 }
 0x128   : > { %v807_v50 = vadd.f32 %v806_v48, %v784_v47 }
 0x12a   : > { %v808_v51 = vrot.slane %v807_v50, 4 }
 0x12c   : > { %v809_v26 = vadd.f32 %v808_v51, %v807_v50 }
 0x12e   : > { %v810_v52 = vrot.slane %v809_v26, 2 }
 0x130   : > { %v811_v53 = vadd.f32 %v810_v52, %v809_v26 }
 0x132   : > { %v812_v54 = vrot.slane %v811_v53, 1 }
 0x134   : > { %v813_v55 = vadd.f32 %v812_v54, %v811_v53 }
 0x136   : > { %v815_v56 = vmul.f32 0.015625, %v813_v55 }
 0x138   : > { %v816_v2 = vsub.f32 %v777_v20, %v815_v56  ;;  %v817_v57 = vsub.f32 %v778_v24, %v815_v56  ;;  %v818_v58 = vsub.f32 %v779_v30, %v815_v56  ;;  %v819_v59 = vsub.f32 %v780_v21, %v815_v56 }
 0x139   : > { %v820_v60 = vsub.f32 %v781_v39, %v815_v56  ;;  %v821_v61 = vsub.f32 %v782_v45, %v815_v56  ;;  %v822_v62 = vsub.f32 %v783_v46, %v815_v56  ;;  %v823_v63 = vsub.f32 %v784_v47, %v815_v56 }
 0x13a   : > { %v824_v4 = vmul.f32 %v816_v2, %v816_v2  ;;  %v825_v19 = vmul.f32 %v817_v57, %v817_v57  ;;  %v826_v40 = vmul.f32 %v818_v58, %v818_v58  ;;  %v827_v1 = vmul.f32 %v819_v59, %v819_v59 }
 0x13b   : > { %v828_v5 = vmul.f32 %v820_v60, %v820_v60  ;;  %v829_v7 = vmul.f32 %v821_v61, %v821_v61  ;;  %v830_v10 = vmul.f32 %v822_v62, %v822_v62  ;;  %v831_v13 = vmul.f32 %v823_v63, %v823_v63 }
 0x13c   : > { %v832_v0 = vadd.f32 %v825_v19, %v824_v4 }
 0x13e   : > { %v833_v3 = vadd.f32 %v832_v0, %v826_v40 }
 0x140   : > { %v834_v6 = vadd.f32 %v833_v3, %v827_v1 }
 0x142   : > { %v835_v8 = vadd.f32 %v834_v6, %v828_v5 }
 0x144   : > { %v836_v9 = vadd.f32 %v835_v8, %v829_v7 }
 0x146   : > { %v837_v11 = vadd.f32 %v836_v9, %v830_v10 }
 0x148   : > { %v838_v12 = vadd.f32 %v837_v11, %v831_v13 }
 0x14a   : > { %v839_v14 = vrot.slane %v838_v12, 4 }
 0x14c   : > { %v840_v49 = vadd.f32 %v839_v14, %v838_v12 }
 0x14e   : > { %v841_v15 = vrot.slane %v840_v49, 2 }
 0x150   : > { %v842_v16 = vadd.f32 %v841_v15, %v840_v49 }
 0x152   : > { %v843_v17 = vrot.slane %v842_v16, 1 }
 0x154   : > { %v844_v18 = vadd.f32 %v843_v17, %v842_v16 }
 0x156   : > { %v845_v20 = vmul.f32 0.015625, %v844_v18 }
 0x158   : > { %v846_v23 = vadd.f32 1e-05, %v845_v20 }
 0x15a   : > { %1255 = vrsqrt.f32 %v846_v23 }
 0x164   : > { %v1256_v24 = vpop.eup %1255 }
 0x165   : > { %v848_v27 = vmul.f32 %v1256_v24, %v816_v2  ;;  %v849_v28 = vmul.f32 %v1256_v24, %v817_v57  ;;  %v850_v29 = vmul.f32 %v1256_v24, %v818_v58  ;;  %v851_v30 = vmul.f32 %v1256_v24, %v819_v59 }
 0x166   : > { %v852_v31 = vmul.f32 %v1256_v24, %v820_v60  ;;  %v853_v32 = vmul.f32 %v1256_v24, %v821_v61  ;;  %v854_v33 = vmul.f32 %v1256_v24, %v822_v62  ;;  %v855_v34 = vmul.f32 %v1256_v24, %v823_v63 }
 0x167   : > { %v1086_v35 = vpack.c.bf16 %v851_v30, %v850_v29  ;;  %v1081_v21 = vpack.c.bf16 %v849_v28, %v848_v27 }
 0x168   : > { %v1091_v22 = vpack.c.bf16 %v853_v32, %v852_v31  ;;  %v1096_v36 = vpack.c.bf16 %v855_v34, %v854_v33 }
 0x169   : > { %1098 = vst [vmem:[%s201_s27 + $0x8] sm:$0xff] %v1086_v35   ;;  %1082 = vst [vmem:[%s201_s27] sm:$0xff] %v1081_v21  }
 0x16a   : > { %1099 = vst [vmem:[%s201_s27 + $0x10] sm:$0xff] %v1091_v22   ;;  %1100 = vst [vmem:[%s201_s27 + $0x18] sm:$0xff] %v1096_v36  }
 0x16b   : > { %1270 = shalt.err (!%p1267_p5)
}
 0x16c   : > { %s1271_s9 = scalar_lea.hbm %s1555_s4, 512  ;;  %s1275_s18 = scalar_lea.hbm %s1608_s3, 1024 }
 0x16d   : > { %p1272_p6 = scmp.ne.s32.totalorder %s1555_s4, %s1271_s9  ;;  %p1276_p10 = scmp.lt.u32.totalorder %s1555_s4, %s1608_s3 }
 0x16e   : > { %p1277_p11 = scmp.lt.u32.totalorder %s1275_s18, %s1271_s9  ;;  %p1279_p13 = scmp.lt.u32.totalorder %s1271_s9, %s1555_s4 }
 0x16f   : > { %p1273_p7 = pnand %p1272_p6, %p1400_p4 }
 0x170   : > { %p1278_p12 = por %p1277_p11, %p1276_p10 }
 0x171   : > { %p1274_p9 = pneg %p1273_p7 }
 0x172   : > { %p1280_p0 = por %p1279_p13, %p1278_p12 }
 0x174   : > { %p1281_p1 = pnand %p1280_p0, %p1274_p9 }
 0x176   : > { %1284 = shalt.err (!%p1281_p1)
}
 0x177   : > { %s1338_s23 = smov 64   ;;  %s1339_s26 = smov 4  }
 0x178   : > { %1186 = dma.vmem_to_hbm [thread:$0]  (%p1400_p4), %s1557_s28, 512, %s1555_s4, %s1559_s15, %s1338_s23, %s1338_s23, %s1339_s26  }
 0x179 PF: > { %p1192_p2 = scmp.ge.s32.totalorder %s1335_s17, 2  ;;  %s926_s27 = sand.u32 1, %s1315_s12  }
 0x17a   : > { %s927_s29 = scalar_lea.sflag [#allocation4], %s926_s27 }
 0x17b   : > { %p1189_p3 = pnand %p1192_p2, %p1407_p8 }
 0x17d   : > { %1310 = dma.done.wait (!%p1189_p3), %s927_s29, 512  }
 0x17e   : > { %1312 = vsyncadd (!%p1189_p3), %s927_s29, 4294966784  ;;  %s16_s17 = sadd.s32 1, %s1335_s17   ;;  %s1613_s12 = smov %s1319_s13 }
 0x17f   : > { %p13_p5 = scmp.ge.s32.totalorder %s16_s17, 4   ;;  %s1614_s13 = smov %s1323_s14 }
 0x180   : > { %s1615_s14 = smov %s1413_s25  ;;  %s1616_s15 = smov %s1331_s16 }
 0x181   : > { %s1617_s16 = smov %s1619_s20  ;;  %15 = sbr.rel (!%p13_p5) target bundleno = 4 (0x4), region = 73 }
 0x188   :  { %932 = vsyncpa [#allocation4], 1 }
 0x189   :  { %934 = vsyncpa [#allocation4 + $0x1], 1 }

</bundles_post_ra>
